<compile_context>
chip_gen: v5e
topology: v5e:2x2
jax: 0.10.0
libtpu: 0.0.40
codegen_flags: <defaults>
</compile_context>

<pallas_src>
import jax
import jax.numpy as jnp
from jax.experimental import pallas as pl
from jax.experimental.pallas import tpu as pltpu


def _identity_kernel(x_ref, o_ref):
    # Pure pass-through of the current (tile_rows, cols) lane-dense tile.
    o_ref[...] = x_ref[...]


# ~2 MiB per block.  With default double-buffering on both input and output,
# resident VMEM is ~4x this (= 8 MiB), comfortably under every generation's
# default scoped-VMEM limit (v5e 16 MiB, v6e 32 MiB, v7x 32 MiB of 64 MiB phys).
_TARGET_TILE_BYTES = 2 * 1024 * 1024


def base_layer_forward(x: jax.Array) -> jax.Array:
    """Identity pass-through for BaseLayer as a Pallas TPU kernel.

    x: (N, C, H, W) array. Returns an array bitwise-equal to x.
    """
    n, c, h, w = x.shape
    rows, cols = n * c, h * w          # lane-dense: H*W on the 128-lane axis
    itemsize = jnp.dtype(x.dtype).itemsize

    x2 = x.reshape(rows, cols)         # row-major reshape: no data movement

    # Largest row-tile that keeps a block <= ~2 MiB; full extent if it all fits.
    sublane = max(1, 32 // itemsize)   # 8 for f32, 16 for bf16, 32 for int8
    max_rows_per_tile = max(1, _TARGET_TILE_BYTES // max(1, cols * itemsize))
    if max_rows_per_tile >= rows:
        tile_rows = rows               # whole tensor in ONE block (test: (8, 256))
    else:
        tile_rows = max(sublane, (max_rows_per_tile // sublane) * sublane)

    grid = (pl.cdiv(rows, tile_rows),)
    spec = pl.BlockSpec((tile_rows, cols), lambda i: (i, 0))

    y2 = pl.pallas_call(
        _identity_kernel,
        out_shape=jax.ShapeDtypeStruct((rows, cols), x.dtype),
        grid_spec=pl.GridSpec(
            grid=grid,
            in_specs=[spec],
            out_specs=spec,
        ),
        compiler_params=pltpu.CompilerParams(
            dimension_semantics=("parallel",),   # shards across v7x's 2 TCs when grid > 1
        ),
        cost_estimate=pl.CostEstimate(
            flops=0,
            transcendentals=0,
            bytes_accessed=2 * rows * cols * itemsize,
        ),
    )(x2)

    return y2.reshape(n, c, h, w)


if __name__ == "__main__":
    key = jax.random.PRNGKey(0)
    # Small NCHW input consistent with a conv-style backbone layer.
    x = jax.random.normal(key, (2, 4, 16, 16), dtype=jnp.float32)

    y = base_layer_forward(x)
    y = jax.block_until_ready(y)

    # Correctness check: BaseLayer has no compute, so output must equal input.
    assert y.shape == x.shape and y.dtype == x.dtype
    assert bool(jnp.all(y == x))

    print("KERNEL_OK")
</pallas_src>

<mosaic_0001>
module attributes {stable_mosaic.version = 11 : i64} {
  func.func @_identity_kernel(%arg0: i32, %arg1: memref<8x256xf32, #tpu.memory_space<vmem>>, %arg2: memref<8x256xf32, #tpu.memory_space<vmem>>) attributes {dimension_semantics = [#tpu.dimension_semantics<parallel>], iteration_bounds = array<i64: 1>, scalar_prefetch = 0 : i64, scratch_operands = 0 : i64, tpu.core_type = #tpu.core_type<tc>, window_params = [{transform_indices = @transform_0, window_bounds = array<i64: 8, 256>}, {transform_indices = @transform_1, window_bounds = array<i64: 8, 256>}]} {
    %c0 = arith.constant 0 : index
    %c0_0 = arith.constant 0 : index
    %0 = vector.load %arg1[%c0, %c0_0] : memref<8x256xf32, #tpu.memory_space<vmem>>, vector<8x256xf32>
    %c0_1 = arith.constant 0 : index
    %c0_2 = arith.constant 0 : index
    %1 = vector.load %arg2[%c0_1, %c0_2] : memref<8x256xf32, #tpu.memory_space<vmem>>, vector<8x256xf32>
    tpu.vector_store %arg2[%c0_1, %c0_2], %0 {strides = array<i32>} : memref<8x256xf32, #tpu.memory_space<vmem>>, vector<8x256xf32>,
    return
  }
  func.func @transform_0(%arg0: i32) -> (i32, i32) {
    %c0_i32 = arith.constant 0 : i32
    %c0_i32_0 = arith.constant 0 : i32
    return %arg0, %c0_i32 : i32, i32
  }
  func.func @transform_1(%arg0: i32) -> (i32, i32) {
    %c0_i32 = arith.constant 0 : i32
    %c0_i32_0 = arith.constant 0 : i32
    return %arg0, %c0_i32 : i32, i32
  }
}

</mosaic_0001>

<bundles_post_ra>
// kernel: tpu_custom_call.1
= control target key start
LH: loop header
LB: loop body
LE: loop exit
PB: predicated region body
PF: predicated region fallthrough
CT: control target
= control target key end

     0   :  { %6 = vsyncpa [#allocation3], 0  ;;  %s116_s0 = inlined_call_operand.hbm [shape: f32[8,256], index: 0, kind: input, shape index: {}]   ;;  %s117_s1 = inlined_call_operand.hbm [shape: f32[8,256], index: 1, kind: output, shape index: {}]  }
   0x1   :  { %7 = vsyncpa [#allocation4], 0  ;;  %s13_s8 = sshll.u32 %s116_s0, 4  ;;  %s98_s9 = smov [#allocation2]   ;;  %s14_s8 = int_to_ptr.hbm [resolvable:$true] %s13_s8 }
   0x2   :  { %s15_s10 = sshll.u32 %s98_s9, 4  ;;  %s16_s10 = int_to_ptr.vmem [resolvable:$true] %s15_s10 }
   0x3   :  { %18 = dma.hbm_to_vmem [thread:$0]  %s14_s8, 256, %s16_s10, [#allocation3]  }
   0x4   :  { %94 = dma.done.wait [#allocation3], 256  }
   0x5   :  { %95 = vsyncadd [#allocation3], 4294967040  ;;  %s99_s11 = smov [#allocation5]   ;;  %s34_s15 = sshll.u32 %s117_s1, 4  ;;  %v23_v0 = vld [vmem:[#allocation2] sm:$0xff]  ;;  %v24_v1 = vld [vmem:[#allocation2 + $0x8] sm:$0xff]  ;;  %s35_s15 = int_to_ptr.hbm [resolvable:$true] %s34_s15 }
   0x6   :  { %s32_s12 = sshll.u32 %s99_s11, 4  ;;  %25 = vst [vmem:[#allocation5] sm:$0xff] %v23_v0  ;;  %s33_s12 = int_to_ptr.vmem [resolvable:$true] %s32_s12 }
   0x7   :  { %26 = vst [vmem:[#allocation5 + $0x8] sm:$0xff] %v24_v1 }
   0x8   :  { %37 = dma.vmem_to_hbm [thread:$0]  %s33_s12, 256, %s35_s15, [#allocation4]  }
   0x9   :  { %96 = dma.done.wait [#allocation4], 256  }
   0xa   :  { %97 = vsyncadd [#allocation4], 4294967040 }
   0xb   :  { %42 = vsyncpa [#allocation3], 1 }
   0xc   :  { %43 = vsyncpa [#allocation4], 1 }

</bundles_post_ra>
